<compile_context>
chip_gen: v6e
topology: v6e:2x2x1
jax: 0.10.0
libtpu: 0.0.40
codegen_flags: <defaults>
</compile_context>

<pallas_src>
import jax
import jax.numpy as jnp
import numpy as np
from jax.experimental import pallas as pl
from jax.experimental.pallas import tpu as pltpu


# ----------------------------------------------------------------------------- kernel

def residual_block_kernel(x_ref, a1_ref, b1_ref, a2_ref, b2_ref, a3_ref, b3_ref, out_ref):
    # x_ref:   (1, H, P) bf16  -- one image, rows flattened to W*C lanes, zero-padded to P lanes
    # a1_ref:  (3, P, P) bf16  -- conv1 3x3: one width-expanded matrix per row tap (W-pad folded in)
    # a2_ref:  (3, P, P) bf16  -- conv2 3x3
    # a3_ref:  (P, P)    bf16  -- conv3 1x1
    # b*_ref:  (1, P)    f32   -- biases tiled across W, zero-padded to P lanes
    # out_ref: (1, H, P) f32
    _, H, P = out_ref.shape
    x = x_ref[0]                                              # (H, P) bf16
    zrow = jnp.zeros((1, P), x.dtype)

    # ---- conv1 (3x3, 'same'): H-padding via register zero rows, 3 row-tap MXU matmuls ----
    xp = jnp.concatenate([zrow, x, zrow], axis=0)             # (H+2, P) bf16
    acc1 = jnp.dot(xp[0:H], a1_ref[0], preferred_element_type=jnp.float32)
    acc1 = acc1 + jnp.dot(x, a1_ref[1], preferred_element_type=jnp.float32)
    acc1 = acc1 + jnp.dot(xp[2:H + 2], a1_ref[2], preferred_element_type=jnp.float32)
    y1 = jnp.maximum(acc1 + b1_ref[...], 0.0)                 # relu(conv1(x)), (H, P) f32
    y1b = y1.astype(x.dtype)                                  # bf16 for the MXU

    # ---- skip branch: 1x1 conv as a single matmul ----
    z = jnp.dot(x, a3_ref[...], preferred_element_type=jnp.float32)

    # ---- conv2 (3x3, 'same'): same row-tap scheme, accumulated in registers ----
    y1p = jnp.concatenate([zrow, y1b, zrow], axis=0)          # (H+2, P) bf16
    acc2 = jnp.dot(y1p[0:H], a2_ref[0], preferred_element_type=jnp.float32)
    acc2 = acc2 + jnp.dot(y1b, a2_ref[1], preferred_element_type=jnp.float32)
    acc2 = acc2 + jnp.dot(y1p[2:H + 2], a2_ref[2], preferred_element_type=jnp.float32)

    # ---- epilogue (f32): biases + skip + residual ReLU, single full-block store ----
    out_ref[0] = jnp.maximum(acc2 + b2_ref[...] + z + b3_ref[...], 0.0)


# ----------------------------------------------------------------------------- weight expansion

def _expand_3x3(w_oihw, width):
    """PyTorch (Cout, Cin, 3, 3) conv weight -> 3 width-expanded matrices (width*Cin, width*Cout).

    A_di[wi*Cin + cin, wo*Cout + cout] = w[cout, cin, di, dj] where wi = wo + dj - 1; taps whose
    source column falls outside [0, width) are dropped (= 'same' zero padding along W).
    """
    cout, cin = int(w_oihw.shape[0]), int(w_oihw.shape[1])
    mats = []
    for di in range(3):
        a = jnp.zeros((width * cin, width * cout), jnp.float32)
        for dj in range(3):
            sel = np.zeros((width, width), np.float32)
            for wo in range(width):
                wi = wo + dj - 1
                if 0 <= wi < width:
                    sel[wi, wo] = 1.0
            tap = w_oihw[:, :, di, dj].T.astype(jnp.float32)          # (Cin, Cout)
            a = a + jnp.kron(jnp.asarray(sel), tap)
        mats.append(a)
    return jnp.stack(mats)                                            # (3, width*Cin, width*Cout)


def _expand_1x1(w_oihw, width):
    """PyTorch (Cout, Cin, 1, 1) weight -> (width*Cin, width*Cout) block-diagonal channel mixer."""
    tap = w_oihw[:, :, 0, 0].T.astype(jnp.float32)                    # (Cin, Cout)
    return jnp.kron(jnp.eye(width, dtype=jnp.float32), tap)


def _pad_last(a, p):
    return jnp.pad(a, [(0, 0)] * (a.ndim - 1) + [(0, p - a.shape[-1])])


def _pad_last2(a, p):
    pads = [(0, 0)] * (a.ndim - 2) + [(0, p - a.shape[-2]), (0, p - a.shape[-1])]
    return jnp.pad(a, pads)


# ----------------------------------------------------------------------------- wrapper

def residual_block(x_nchw, params):
    """params: PyTorch-layout (OIHW) conv weights and biases, as in nn.Conv2d."""
    w1, b1, w2, b2, w3, b3 = params
    B, C, H, W = x_nchw.shape
    WC = W * C
    P = ((WC + 127) // 128) * 128                     # lane-dense padded row width (here 128)

    # NCHW -> NHWC -> (B, H, W*C) lane slabs, zero-padded to P lanes, bf16 for the MXU.
    x = jnp.transpose(x_nchw, (0, 2, 3, 1)).reshape(B, H, WC).astype(jnp.float32)
    x = _pad_last(x, P).astype(jnp.bfloat16)

    # Width-expanded weights ('same' W-padding folded in), zero-padded to PxP lanes, bf16 for the
    # MXU.  Padded K rows / N columns are zero so padded lanes never contaminate the real output.
    a1 = _pad_last2(_expand_3x3(w1, W), P).astype(jnp.bfloat16)       # (3, P, P)
    a2 = _pad_last2(_expand_3x3(w2, W), P).astype(jnp.bfloat16)       # (3, P, P)
    a3 = _pad_last2(_expand_1x1(w3, W), P).astype(jnp.bfloat16)       # (P, P)
    b1r = _pad_last(jnp.tile(b1.astype(jnp.float32), W), P).reshape(1, P)
    b2r = _pad_last(jnp.tile(b2.astype(jnp.float32), W), P).reshape(1, P)
    b3r = _pad_last(jnp.tile(b3.astype(jnp.float32), W), P).reshape(1, P)

    out = pl.pallas_call(
        residual_block_kernel,
        out_shape=jax.ShapeDtypeStruct((B, H, P), jnp.float32),
        grid_spec=pltpu.PrefetchScalarGridSpec(
            num_scalar_prefetch=0,
            grid=(B,),                                                 # one image per step, pipelined
            in_specs=[
                pl.BlockSpec((1, H, P), lambda b: (b, 0, 0)),          # per-image activation slab
                pl.BlockSpec((3, P, P), lambda b: (0, 0, 0)),          # conv1 weights (grid-invariant)
                pl.BlockSpec((1, P), lambda b: (0, 0)),
                pl.BlockSpec((3, P, P), lambda b: (0, 0, 0)),          # conv2 weights
                pl.BlockSpec((1, P), lambda b: (0, 0)),
                pl.BlockSpec((P, P), lambda b: (0, 0)),                # conv3 (1x1) weights
                pl.BlockSpec((1, P), lambda b: (0, 0)),
            ],
            out_specs=pl.BlockSpec((1, H, P), lambda b: (b, 0, 0)),
        ),
        compiler_params=pltpu.CompilerParams(
            dimension_semantics=("parallel",),        # shard images across TCs on v7x megacore
            vmem_limit_bytes=32 * 1024 * 1024,        # explicit; per-step footprint is ~0.5 MB
        ),
    )(x, a1, b1r, a2, b2r, a3, b3r)

    out = out[:, :, :WC].reshape(B, H, W, C)          # drop padded lanes
    return jnp.transpose(out, (0, 3, 1, 2))           # NHWC -> NCHW


# ----------------------------------------------------------------------------- init + reference

def init_params(key, channels):
    """Deterministic init mimicking nn.Conv2d default (uniform(-1/sqrt(fan_in), +...))."""
    ks = jax.random.split(key, 6)

    def conv_init(kw, kb, cout, cin, kh, kwid):
        fan_in = cin * kh * kwid
        bound = 1.0 / np.sqrt(fan_in)
        w = jax.random.uniform(kw, (cout, cin, kh, kwid), jnp.float32, -bound, bound)
        b = jax.random.uniform(kb, (cout,), jnp.float32, -bound, bound)
        return w, b

    w1, b1 = conv_init(ks[0], ks[1], channels, channels, 3, 3)
    w2, b2 = conv_init(ks[2], ks[3], channels, channels, 3, 3)
    w3, b3 = conv_init(ks[4], ks[5], channels, channels, 1, 1)
    return w1, b1, w2, b2, w3, b3


def reference(x, params):
    """Plain-JAX NCHW f32 reference matching the PyTorch module."""
    w1, b1, w2, b2, w3, b3 = params
    dn = ('NCHW', 'OIHW', 'NCHW')
    y = jax.lax.conv_general_dilated(x, w1, (1, 1), ((1, 1), (1, 1)),
                                     dimension_numbers=dn) + b1[None, :, None, None]
    y = jnp.maximum(y, 0.0)
    y = jax.lax.conv_general_dilated(y, w2, (1, 1), ((1, 1), (1, 1)),
                                     dimension_numbers=dn) + b2[None, :, None, None]
    z = jax.lax.conv_general_dilated(x, w3, (1, 1), ((0, 0), (0, 0)),
                                     dimension_numbers=dn) + b3[None, :, None, None]
    return jnp.maximum(z + y, 0.0)


if __name__ == "__main__":
    key = jax.random.PRNGKey(0)
    k_x, k_p = jax.random.split(key)

    B, C, H, W = 2, 4, 16, 16
    x = jax.random.normal(k_x, (B, C, H, W), jnp.float32)
    params = init_params(k_p, C)

    out = residual_block(x, params)
    out = jax.block_until_ready(out)

    ref = jax.block_until_ready(reference(x, params))
    assert out.shape == (B, C, H, W)
    # bf16 MXU inputs (f32 accumulation) vs. the pure-f32 reference -> loosened tolerance.
    np.testing.assert_allclose(np.asarray(out), np.asarray(ref), atol=5e-2, rtol=5e-2)

    print("KERNEL_OK")
</pallas_src>

<mosaic_0001>
module attributes {stable_mosaic.version = 11 : i64} {
  func.func @residual_block_kernel(%arg0: i32, %arg1: memref<1x16x128xbf16, #tpu.memory_space<vmem>>, %arg2: memref<3x128x128xbf16, #tpu.memory_space<vmem>>, %arg3: memref<1x128xf32, #tpu.memory_space<vmem>>, %arg4: memref<3x128x128xbf16, #tpu.memory_space<vmem>>, %arg5: memref<1x128xf32, #tpu.memory_space<vmem>>, %arg6: memref<128x128xbf16, #tpu.memory_space<vmem>>, %arg7: memref<1x128xf32, #tpu.memory_space<vmem>>, %arg8: memref<1x16x128xf32, #tpu.memory_space<vmem>>) attributes {dimension_semantics = [#tpu.dimension_semantics<parallel>], iteration_bounds = array<i64: 2>, scalar_prefetch = 0 : i64, scratch_operands = 0 : i64, tpu.core_type = #tpu.core_type<tc>, window_params = [{transform_indices = @transform_0, window_bounds = array<i64: 1, 16, 128>}, {pipeline_mode = #tpu.pipeline_mode<synchronous>, transform_indices = @transform_1, window_bounds = array<i64: 3, 128, 128>}, {pipeline_mode = #tpu.pipeline_mode<synchronous>, transform_indices = @transform_2, window_bounds = array<i64: 1, 128>}, {pipeline_mode = #tpu.pipeline_mode<synchronous>, transform_indices = @transform_3, window_bounds = array<i64: 3, 128, 128>}, {pipeline_mode = #tpu.pipeline_mode<synchronous>, transform_indices = @transform_4, window_bounds = array<i64: 1, 128>}, {pipeline_mode = #tpu.pipeline_mode<synchronous>, transform_indices = @transform_5, window_bounds = array<i64: 128, 128>}, {pipeline_mode = #tpu.pipeline_mode<synchronous>, transform_indices = @transform_6, window_bounds = array<i64: 1, 128>}, {transform_indices = @transform_7, window_bounds = array<i64: 1, 16, 128>}]} {
    %c0 = arith.constant 0 : index
    %c0_0 = arith.constant 0 : index
    %c0_1 = arith.constant 0 : index
    %0 = vector.load %arg1[%c0, %c0_0, %c0_1] : memref<1x16x128xbf16, #tpu.memory_space<vmem>>, vector<1x16x128xbf16>
    %1 = vector.shape_cast %0 : vector<1x16x128xbf16> to vector<16x128xbf16>
    %cst = arith.constant 0.000000e+00 : bf16
    %2 = vector.broadcast %cst : bf16 to vector<1x128xbf16>
    %3 = tpu.concatenate %2, %1, %2 in 0 : vector<1x128xbf16>, vector<16x128xbf16>, vector<1x128xbf16> -> vector<18x128xbf16>
    %4 = vector.extract_strided_slice %3 {offsets = [0, 0], sizes = [16, 128], strides = [1, 1]} : vector<18x128xbf16> to vector<16x128xbf16>
    %c0_2 = arith.constant 0 : index
    %c0_3 = arith.constant 0 : index
    %c0_4 = arith.constant 0 : index
    %5 = vector.load %arg2[%c0_2, %c0_3, %c0_4] : memref<3x128x128xbf16, #tpu.memory_space<vmem>>, vector<1x128x128xbf16>
    %6 = vector.shape_cast %5 : vector<1x128x128xbf16> to vector<128x128xbf16>
    %cst_5 = arith.constant dense<0.000000e+00> : vector<16x128xf32>
    %7 = tpu.matmul %4, %6, %cst_5 {dimension_numbers = #tpu.dot_dimension_numbers<[1], [0], [0], [1], [0, 0, 1, 1], [], []>} : vector<16x128xbf16>, vector<128x128xbf16>, vector<16x128xf32> -> vector<16x128xf32>
    %c1 = arith.constant 1 : index
    %c0_6 = arith.constant 0 : index
    %c0_7 = arith.constant 0 : index
    %8 = vector.load %arg2[%c1, %c0_6, %c0_7] : memref<3x128x128xbf16, #tpu.memory_space<vmem>>, vector<1x128x128xbf16>
    %9 = vector.shape_cast %8 : vector<1x128x128xbf16> to vector<128x128xbf16>
    %cst_8 = arith.constant dense<0.000000e+00> : vector<16x128xf32>
    %10 = tpu.matmul %1, %9, %cst_8 {dimension_numbers = #tpu.dot_dimension_numbers<[1], [0], [0], [1], [0, 0, 1, 1], [], []>} : vector<16x128xbf16>, vector<128x128xbf16>, vector<16x128xf32> -> vector<16x128xf32>
    %11 = arith.addf %7, %10 : vector<16x128xf32>
    %12 = vector.extract_strided_slice %3 {offsets = [2, 0], sizes = [16, 128], strides = [1, 1]} : vector<18x128xbf16> to vector<16x128xbf16>
    %c2 = arith.constant 2 : index
    %c0_9 = arith.constant 0 : index
    %c0_10 = arith.constant 0 : index
    %13 = vector.load %arg2[%c2, %c0_9, %c0_10] : memref<3x128x128xbf16, #tpu.memory_space<vmem>>, vector<1x128x128xbf16>
    %14 = vector.shape_cast %13 : vector<1x128x128xbf16> to vector<128x128xbf16>
    %cst_11 = arith.constant dense<0.000000e+00> : vector<16x128xf32>
    %15 = tpu.matmul %12, %14, %cst_11 {dimension_numbers = #tpu.dot_dimension_numbers<[1], [0], [0], [1], [0, 0, 1, 1], [], []>} : vector<16x128xbf16>, vector<128x128xbf16>, vector<16x128xf32> -> vector<16x128xf32>
    %16 = arith.addf %11, %15 : vector<16x128xf32>
    %c0_12 = arith.constant 0 : index
    %c0_13 = arith.constant 0 : index
    %17 = vector.load %arg3[%c0_12, %c0_13] : memref<1x128xf32, #tpu.memory_space<vmem>>, vector<1x128xf32>
    %18 = vector.broadcast %17 : vector<1x128xf32> to vector<16x128xf32>
    %19 = arith.addf %16, %18 : vector<16x128xf32>
    %cst_14 = arith.constant 0.000000e+00 : f32
    %20 = vector.broadcast %cst_14 : f32 to vector<16x128xf32>
    %21 = arith.maximumf %19, %20 : vector<16x128xf32>
    %22 = arith.truncf %21 : vector<16x128xf32> to vector<16x128xbf16>
    %c0_15 = arith.constant 0 : index
    %c0_16 = arith.constant 0 : index
    %23 = vector.load %arg6[%c0_15, %c0_16] : memref<128x128xbf16, #tpu.memory_space<vmem>>, vector<128x128xbf16>
    %cst_17 = arith.constant dense<0.000000e+00> : vector<16x128xf32>
    %24 = tpu.matmul %1, %23, %cst_17 {dimension_numbers = #tpu.dot_dimension_numbers<[1], [0], [0], [1], [0, 0, 1, 1], [], []>} : vector<16x128xbf16>, vector<128x128xbf16>, vector<16x128xf32> -> vector<16x128xf32>
    %25 = tpu.concatenate %2, %22, %2 in 0 : vector<1x128xbf16>, vector<16x128xbf16>, vector<1x128xbf16> -> vector<18x128xbf16>
    %26 = vector.extract_strided_slice %25 {offsets = [0, 0], sizes = [16, 128], strides = [1, 1]} : vector<18x128xbf16> to vector<16x128xbf16>
    %c0_18 = arith.constant 0 : index
    %c0_19 = arith.constant 0 : index
    %c0_20 = arith.constant 0 : index
    %27 = vector.load %arg4[%c0_18, %c0_19, %c0_20] : memref<3x128x128xbf16, #tpu.memory_space<vmem>>, vector<1x128x128xbf16>
    %28 = vector.shape_cast %27 : vector<1x128x128xbf16> to vector<128x128xbf16>
    %cst_21 = arith.constant dense<0.000000e+00> : vector<16x128xf32>
    %29 = tpu.matmul %26, %28, %cst_21 {dimension_numbers = #tpu.dot_dimension_numbers<[1], [0], [0], [1], [0, 0, 1, 1], [], []>} : vector<16x128xbf16>, vector<128x128xbf16>, vector<16x128xf32> -> vector<16x128xf32>
    %c1_22 = arith.constant 1 : index
    %c0_23 = arith.constant 0 : index
    %c0_24 = arith.constant 0 : index
    %30 = vector.load %arg4[%c1_22, %c0_23, %c0_24] : memref<3x128x128xbf16, #tpu.memory_space<vmem>>, vector<1x128x128xbf16>
    %31 = vector.shape_cast %30 : vector<1x128x128xbf16> to vector<128x128xbf16>
    %cst_25 = arith.constant dense<0.000000e+00> : vector<16x128xf32>
    %32 = tpu.matmul %22, %31, %cst_25 {dimension_numbers = #tpu.dot_dimension_numbers<[1], [0], [0], [1], [0, 0, 1, 1], [], []>} : vector<16x128xbf16>, vector<128x128xbf16>, vector<16x128xf32> -> vector<16x128xf32>
    %33 = arith.addf %29, %32 : vector<16x128xf32>
    %34 = vector.extract_strided_slice %25 {offsets = [2, 0], sizes = [16, 128], strides = [1, 1]} : vector<18x128xbf16> to vector<16x128xbf16>
    %c2_26 = arith.constant 2 : index
    %c0_27 = arith.constant 0 : index
    %c0_28 = arith.constant 0 : index
    %35 = vector.load %arg4[%c2_26, %c0_27, %c0_28] : memref<3x128x128xbf16, #tpu.memory_space<vmem>>, vector<1x128x128xbf16>
    %36 = vector.shape_cast %35 : vector<1x128x128xbf16> to vector<128x128xbf16>
    %cst_29 = arith.constant dense<0.000000e+00> : vector<16x128xf32>
    %37 = tpu.matmul %34, %36, %cst_29 {dimension_numbers = #tpu.dot_dimension_numbers<[1], [0], [0], [1], [0, 0, 1, 1], [], []>} : vector<16x128xbf16>, vector<128x128xbf16>, vector<16x128xf32> -> vector<16x128xf32>
    %38 = arith.addf %33, %37 : vector<16x128xf32>
    %c0_30 = arith.constant 0 : index
    %c0_31 = arith.constant 0 : index
    %39 = vector.load %arg5[%c0_30, %c0_31] : memref<1x128xf32, #tpu.memory_space<vmem>>, vector<1x128xf32>
    %40 = vector.broadcast %39 : vector<1x128xf32> to vector<16x128xf32>
    %41 = arith.addf %38, %40 : vector<16x128xf32>
    %42 = arith.addf %41, %24 : vector<16x128xf32>
    %c0_32 = arith.constant 0 : index
    %c0_33 = arith.constant 0 : index
    %43 = vector.load %arg7[%c0_32, %c0_33] : memref<1x128xf32, #tpu.memory_space<vmem>>, vector<1x128xf32>
    %44 = vector.broadcast %43 : vector<1x128xf32> to vector<16x128xf32>
    %45 = arith.addf %42, %44 : vector<16x128xf32>
    %cst_34 = arith.constant 0.000000e+00 : f32
    %46 = vector.broadcast %cst_34 : f32 to vector<16x128xf32>
    %47 = arith.maximumf %45, %46 : vector<16x128xf32>
    %c0_35 = arith.constant 0 : index
    %c0_36 = arith.constant 0 : index
    %c0_37 = arith.constant 0 : index
    %48 = vector.load %arg8[%c0_35, %c0_36, %c0_37] : memref<1x16x128xf32, #tpu.memory_space<vmem>>, vector<1x16x128xf32>
    %49 = vector.shape_cast %48 : vector<1x16x128xf32> to vector<16x128xf32>
    %50 = vector.shape_cast %47 : vector<16x128xf32> to vector<1x16x128xf32>
    tpu.vector_store %arg8[%c0_35, %c0_36, %c0_37], %50 {strides = array<i32>} : memref<1x16x128xf32, #tpu.memory_space<vmem>>, vector<1x16x128xf32>,
    return
  }
  func.func @transform_0(%arg0: i32) -> (i32, i32, i32) {
    %c0_i32 = arith.constant 0 : i32
    %c0_i32_0 = arith.constant 0 : i32
    %c0_i32_1 = arith.constant 0 : i32
    return %arg0, %c0_i32, %c0_i32_0 : i32, i32, i32
  }
  func.func @transform_1(%arg0: i32) -> (i32, i32, i32) {
    %c0_i32 = arith.constant 0 : i32
    %c0_i32_0 = arith.constant 0 : i32
    %c0_i32_1 = arith.constant 0 : i32
    %c0_i32_2 = arith.constant 0 : i32
    return %c0_i32, %c0_i32_0, %c0_i32_1 : i32, i32, i32
  }
  func.func @transform_2(%arg0: i32) -> (i32, i32) {
    %c0_i32 = arith.constant 0 : i32
    %c0_i32_0 = arith.constant 0 : i32
    %c0_i32_1 = arith.constant 0 : i32
    return %c0_i32, %c0_i32_0 : i32, i32
  }
  func.func @transform_3(%arg0: i32) -> (i32, i32, i32) {
    %c0_i32 = arith.constant 0 : i32
    %c0_i32_0 = arith.constant 0 : i32
    %c0_i32_1 = arith.constant 0 : i32
    %c0_i32_2 = arith.constant 0 : i32
    return %c0_i32, %c0_i32_0, %c0_i32_1 : i32, i32, i32
  }
  func.func @transform_4(%arg0: i32) -> (i32, i32) {
    %c0_i32 = arith.constant 0 : i32
    %c0_i32_0 = arith.constant 0 : i32
    %c0_i32_1 = arith.constant 0 : i32
    return %c0_i32, %c0_i32_0 : i32, i32
  }
  func.func @transform_5(%arg0: i32) -> (i32, i32) {
    %c0_i32 = arith.constant 0 : i32
    %c0_i32_0 = arith.constant 0 : i32
    %c0_i32_1 = arith.constant 0 : i32
    return %c0_i32, %c0_i32_0 : i32, i32
  }
  func.func @transform_6(%arg0: i32) -> (i32, i32) {
    %c0_i32 = arith.constant 0 : i32
    %c0_i32_0 = arith.constant 0 : i32
    %c0_i32_1 = arith.constant 0 : i32
    return %c0_i32, %c0_i32_0 : i32, i32
  }
  func.func @transform_7(%arg0: i32) -> (i32, i32, i32) {
    %c0_i32 = arith.constant 0 : i32
    %c0_i32_0 = arith.constant 0 : i32
    %c0_i32_1 = arith.constant 0 : i32
    return %arg0, %c0_i32, %c0_i32_0 : i32, i32, i32
  }
}

</mosaic_0001>

<bundles_post_ra>
// kernel: tpu_custom_call.1
= control target key start
LH: loop header
LB: loop body
LE: loop exit
PB: predicated region body
PF: predicated region fallthrough
CT: control target
= control target key end

     0   :  { %s2254_s0 = inlined_call_operand.hbm [shape: bf16[2,16,128], index: 0, kind: input, shape index: {}]   ;;  %s2255_s1 = inlined_call_operand.hbm [shape: bf16[3,128,128], index: 1, kind: input, shape index: {}]   ;;  %s2256_s2 = inlined_call_operand.vmem [shape: f32[1,128], index: 2, kind: input, shape index: {}]   ;;  %s2257_s3 = inlined_call_operand.hbm [shape: bf16[3,128,128], index: 3, kind: input, shape index: {}]   ;;  %s2258_s4 = inlined_call_operand.vmem [shape: f32[1,128], index: 4, kind: input, shape index: {}]   ;;  %s2259_s5 = inlined_call_operand.hbm [shape: bf16[128,128], index: 5, kind: input, shape index: {}]   ;;  %s2260_s6 = inlined_call_operand.vmem [shape: f32[1,128], index: 6, kind: input, shape index: {}]   ;;  %s2261_s7 = inlined_call_operand.hbm [shape: f32[2,16,128], index: 7, kind: output, shape index: {}]  }
   0x1   :  { %2268 = sst [smem:[#allocation15_spill]] %s2255_s1 }
   0x2   :  { %12 = vsyncpa [#allocation3], 0 }
   0x3   :  { %14 = vsyncpa [#allocation3 + $0x1], 0 }
   0x4   :  { %15 = vsyncpa [#allocation6], 0 }
   0x5   :  { %16 = vsyncpa [#allocation9], 0 }
   0x6   :  { %17 = vsyncpa [#allocation4], 0 }
   0x7   :  { %19 = vsyncpa [#allocation4 + $0x1], 0  ;;  %s1939_s24 = smov 0   ;;  %s1941_s25 = smov 0  }
   0x8   :  { %s1943_s26 = smov 0   ;;  %s1945_s27 = smov 0  }
   0x9 LB: > { %s1960_s28 = sadd.s32 4294967295, %s1886_s27   ;;  %s1283_s29 = sadd.s32 4294967294, %s1886_s27   ;;  %s1886_s27 = sphi %s1945_s27, %s2292_s27   ;;  %s1882_s26 = sphi %s1943_s26, %s2291_s26   ;;  %s1878_s25 = sphi %s1941_s25, %s2290_s25   ;;  %s1874_s24 = sphi %s1939_s24, %s2289_s24  }
   0xa   : > { %p45_p0 = scmp.ne.s32.totalorder %s1878_s25, %s1874_s24  ;;  %p2262_p1 = scmp.eq.s32.totalorder %s1960_s28, 0 }
   0xb   : > { %p195_p2 = scmp.eq.s32.totalorder %s1960_s28, 1  ;;  %p201_p3 = scmp.eq.s32.totalorder %s1283_s29, 1 }
   0xc   : > { %p1969_p4 = por %p2262_p1, %p45_p0  ;;  %p1284_p5 = scmp.ge.s32.totalorder %s1886_s27, 1 }
   0xd   : > { %p1974_p6 = por %p201_p3, %p45_p0  ;;  %p208_p7 = scmp.lt.s32.totalorder %s1886_s27, 3 }
   0xe   : > { %s2269_s30 = scalar_select %p1969_p4, 1, 0 }
   0xf   : > { %s2270_s8 = scalar_select %p1974_p6, 1, 0 }
  0x10   : > { %p1979_p8 = pnand %p1284_p5, %p208_p7  ;;  %s1888_s10 = smov [#allocation5]  }
  0x11   : > { %s220_s11 = sshll.u32 %s1888_s10, 4  ;;  %s1889_s13 = smov [#allocation7]   ;;  %s221_s11 = int_to_ptr.vmem [resolvable:$true] %s220_s11 }
  0x12   : > { %s2271_s9 = scalar_select %p1979_p8, 1, 0 }
  0x13   : > { %p1584_p9 = pneg %p1979_p8  ;;  %s236_s14 = sshll.u32 %s1889_s13, 4  ;;  %s237_s14 = int_to_ptr.vmem [resolvable:$true] %s236_s14 }
  0x14   : > { %s1890_s15 = smov [#allocation8]   ;;  %s1719_s17 = scalar_lea.vmem %s221_s11, 3072 }
  0x15   : > { %p1988_p11 = pnand %p1584_p9, %p2262_p1  ;;  %s252_s16 = sshll.u32 %s1890_s15, 4  ;;  %s253_s16 = int_to_ptr.vmem [resolvable:$true] %s252_s16 }
  0x16   : > { %p1720_p13 = scmp.ne.s32.totalorder %s221_s11, %s1719_s17  ;;  %p1727_p5 = scmp.lt.s32.totalorder %s221_s11, %s221_s11 }
  0x17   : > { %p1710_p12 = pneg %p1988_p11  ;;  %p1728_p7 = scmp.lt.s32.totalorder %s1719_s17, %s1719_s17 }
  0x19   : > { %p1722_p0 = pnand %p1720_p13, %p1710_p12  ;;  %p1729_p9 = por %p1728_p7, %p1727_p5 }
  0x1b   : > { %p1723_p3 = pneg %p1722_p0 }
  0x1d   : > { %p1730_p10 = pnand %p1729_p9, %p1723_p3 }
  0x1f   : > { %1733 = shalt.err (!%p1730_p10)
}
  0x20   : > { %s2263_s18 = smov 64   ;;  %s2264_s19 = smov 4  }
  0x21   : > { %s2273_s1 = sld [smem:[#allocation15_spill]]  ;;  %s1745_s22 = scalar_lea.vmem %s237_s14, 3072 }
  0x22   : > { %p1746_p13 = scmp.ne.s32.totalorder %s237_s14, %s1745_s22  ;;  %p1753_p3 = scmp.lt.s32.totalorder %s237_s14, %s237_s14 }
  0x23   : > { %p1754_p10 = scmp.lt.s32.totalorder %s1745_s22, %s1745_s22 }
  0x24   : > { %p1748_p0 = pnand %p1746_p13, %p1710_p12 }
  0x25   : > { %p1755_p7 = por %p1754_p10, %p1753_p3 }
  0x26   : > { %p1749_p5 = pneg %p1748_p0 }
  0x27   : > { %1587 = dma.hbm_to_vmem [thread:$0]  (!%p1988_p11), %s2273_s1, 3072, %s221_s11, [#allocation6], %s2263_s18, %s2263_s18, %s2264_s19  }
  0x28   : > { %p1756_p9 = pnand %p1755_p7, %p1749_p5 }
  0x2a   : > { %1759 = shalt.err (!%p1756_p9)
}
  0x2b   : > { %1590 = dma.hbm_to_vmem [thread:$0]  (!%p1988_p11), %s2257_s3, 3072, %s237_s14, [#allocation6], %s2263_s18, %s2263_s18, %s2264_s19  }
  0x2c   : > { %s1771_s10 = scalar_lea.vmem %s253_s16, 1024  ;;  %p1779_p3 = scmp.lt.s32.totalorder %s253_s16, %s253_s16 }
  0x2d   : > { %p1772_p1 = scmp.ne.s32.totalorder %s253_s16, %s1771_s10  ;;  %p1780_p5 = scmp.lt.s32.totalorder %s1771_s10, %s1771_s10 }
  0x2f   : > { %p1774_p13 = pnand %p1772_p1, %p1710_p12  ;;  %p1781_p10 = por %p1780_p5, %p1779_p3 }
  0x31   : > { %p1775_p0 = pneg %p1774_p13 }
  0x33   : > { %p1782_p7 = pnand %p1781_p10, %p1775_p0 }
  0x35   : > { %1785 = shalt.err (!%p1782_p7)
}
  0x36   : > { %1593 = dma.hbm_to_vmem [thread:$0]  (!%p1988_p11), %s2259_s5, 1024, %s253_s16, [#allocation9], %s2263_s18, %s2263_s18, %s2264_s19  }
  0x37   : > { %s2028_s14 = sadd.s32 1, %s1886_s27   ;;  %s32_s15 = sadd.s32 1, %s1882_s26 }
  0x38   : > { %s29_s12 = ssub.s32 %s1886_s27, %s2028_s14  ;;  %p39_p12 = scmp.ne.s32.totalorder %s1882_s26, %s1878_s25 }
  0x39   : > { %p30_p1 = scmp.eq.s32.totalorder %s29_s12, 0  ;;  %p40_p9 = scmp.eq.s32.totalorder %s1886_s27, 0 }
  0x3a   : > { %p1605_p13 = scmp.lt.s32.totalorder %s1886_s27, 2  ;;  %p2042_p3 = por %p195_p2, %p39_p12 }
  0x3b   : > { %s2038_s17 = scalar_select %p30_p1, %s1882_s26, %s32_s15  }
  0x3c   : > { %p41_p0 = por %p40_p9, %p39_p12  ;;  %s269_s21 = sand.u32 1, %s1882_s26  }
  0x3d   : > { %s2274_s20 = scalar_select %p2042_p3, 1, 0 }
  0x3e   : > { %s1363_s22 = sshll.u32 %s1886_s27, 7  ;;  %s1289_s16 = sshll.u32 %s269_s21, 3 }
  0x3f   : > { %s2051_s10 = scalar_lea.hbm %s2254_s0, %s1363_s22  ;;  %s273_s11 = scalar_lea.vmem [#allocation2], %s1289_s16 }
  0x40   : > { %s280_s13 = sshll.u32 %s273_s11, 4  ;;  %p2053_p11 = pnand %p1605_p13, %p41_p0  ;;  %s2057_s13 = int_to_ptr.vmem [resolvable:$true] %s280_s13 }
  0x41   : > { %s2059_s15 = scalar_lea.sflag [#allocation3], %s269_s21  ;;  %s1786_s18 = scalar_lea.hbm %s2051_s10, 128 }
  0x42   : > { %p1787_p2 = scmp.ne.s32.totalorder %s2051_s10, %s1786_s18  ;;  %p1788_p5 = pneg %p2053_p11 }
  0x43   : > { %s1791_s16 = scalar_lea.hbm %s2254_s0, 256  ;;  %p1792_p1 = scmp.lt.s32.totalorder %s2051_s10, %s2254_s0 }
  0x44   : > { %p1789_p10 = pnand %p1788_p5, %p1787_p2  ;;  %p1793_p12 = scmp.lt.s32.totalorder %s1791_s16, %s1786_s18 }
  0x46   : > { %p1790_p7 = pneg %p1789_p10  ;;  %p1794_p9 = por %p1793_p12, %p1792_p1 }
  0x48   : > { %p1795_p13 = pnand %p1794_p9, %p1790_p7 }
  0x4a   : > { %1798 = shalt.err (!%p1795_p13)
}
  0x4b   : > { %s1799_s21 = scalar_lea.vmem %s2057_s13, 128  ;;  %s1893_s19 = smov [#allocation2]  }
  0x4c   : > { %p1800_p0 = scmp.ne.s32.totalorder %s2057_s13, %s1799_s21  ;;  %s1804_s1 = sshll.u32 %s1893_s19, 4  ;;  %s1805_s1 = int_to_ptr.vmem [resolvable:$false] %s1804_s1 }
  0x4d   : > { %s1806_s22 = scalar_lea.vmem %s1805_s1, 256  ;;  %p1807_p10 = scmp.lt.s32.totalorder %s2057_s13, %s1805_s1 }
  0x4e   : > { %p1802_p6 = pnand %p1800_p0, %p1788_p5  ;;  %p1808_p3 = scmp.lt.s32.totalorder %s1806_s22, %s1799_s21 }
  0x50   : > { %p1803_p2 = pneg %p1802_p6  ;;  %p1809_p4 = por %p1808_p3, %p1807_p10 }
  0x52   : > { %p1810_p8 = pnand %p1809_p4, %p1803_p2 }
  0x54   : > { %1813 = shalt.err (!%p1810_p8)
}
  0x55   : > { %s2276_s18 = smov 4   ;;  %s2277_s23 = smov 64  }
  0x56   : > { %1597 = dma.hbm_to_vmem [thread:$0]  (!%p2053_p11), %s2051_s10, 128, %s2057_s13, %s2059_s15, %s2277_s23, %s2277_s23, %s2276_s18  }
  0x57   : > { %p2278_p6 = scmp.ne.s32.totalorder %s2271_s9, 0 }
  0x58   : > { %s2086_s19 = sand.u32 (!%p2278_p6), 1, %s1878_s25   ;;  %p2279_p4 = scmp.ne.s32.totalorder (!%p2278_p6), %s2269_s30, 0 }
  0x59   : > { %292 = sbr.rel (%p2278_p6) target bundleno = 626 (0x272), region = 48  ;;  %s1293_s1 = sshll.u32 (!%p2278_p6), %s2086_s19, 3 }
  0x5a   : > { %s295_s16 = scalar_lea.sflag (!%p2278_p6), [#allocation3], %s2086_s19  ;;  %s2090_s29 = scalar_lea.vmem (!%p2278_p6), [#allocation2], %s1293_s1 }
  0x5e   : > { %1857 = dma.done.wait (%p2279_p4), %s295_s16, 128  }
  0x5f   : > { %1859 = vsyncadd (%p2279_p4), %s295_s16, 4294967168  ;;  %p2280_p8 = scmp.eq.s32.totalorder %s1960_s28, 0 }
  0x61   : > { %1861 = dma.done.wait (%p2280_p8), [#allocation6], 6144   ;;  %p2281_p3 = pmov %p2280_p8 }
  0x63   : > { %1863 = vsyncadd (%p2281_p3), [#allocation6], 4294961152  ;;  %p2282_p11 = pmov %p2281_p3 }
  0x64   : > { %p2283_p5 = pmov %p2281_p3 }
  0x65   : > { %1865 = dma.done.wait (%p2282_p11), [#allocation9], 1024  }
  0x66   : > { %1867 = vsyncadd (%p2283_p5), [#allocation9], 4294966272  ;;  %v1894_v0 = vmov 0.0   ;;  %vm1895_vm0 = vmmov 0   ;;  %v1651_v1 = vld [vmem:[#allocation5 + $0x78] sm:$0xff]   ;;  %v1653_v3 = vld [vmem:[#allocation5 + $0x70] sm:$0xff]  }
  0x67   : > { %1428 = vmatprep.subr.bf16.mxu0 %v1894_v0  ;;  %1448 = vmatprep.subr.bf16.mxu1 %v1894_v0  ;;  %v1652_v2 = vld [vmem:[#allocation5 + $0x38] sm:$0xff]   ;;  %v1654_v4 = vld [vmem:[#allocation5 + $0x30] sm:$0xff]   ;;  %v1655_v5 = vld [vmem:[#allocation5 + $0x68] sm:$0xff]   ;;  %vm359_vm1 = vsmask.f32 256  ;;  %vm358_vm2 = vcmask 1040384  }
  0x68   : > { %1444 = vmatprep.mubr.msk.bf16.mxu0 %vm1895_vm0, %v1894_v0  ;;  %1464 = vmatprep.mubr.msk.bf16.mxu1 %vm1895_vm0, %v1894_v0  ;;  %v1656_v6 = vld [vmem:[#allocation5 + $0x28] sm:$0xff]   ;;  %v1657_v7 = vld [vmem:[#allocation5 + $0x60] sm:$0xff]   ;;  %v1659_v9 = vld [vmem:[#allocation5 + $0x58] sm:$0xff]   ;;  %vm594_vm4 = vcmask 1046528   ;;  %s1297_s11 = sshll.u32 %s2086_s19, 4  ;;  %s1364_s21 = sshll.u32 %s1960_s28, 8 }
  0x69   : > { %1429 = vmatpush3.bf16.msra.mxu0 %v1651_v1  ;;  %1449 = vmatpush3.bf16.msra.mxu1 %v1652_v2  ;;  %v1658_v8 = vld [vmem:[#allocation5 + $0x20] sm:$0xff]   ;;  %v1660_v10 = vld [vmem:[#allocation5 + $0x18] sm:$0xff]   ;;  %v1661_v12 = vld [vmem:[#allocation5 + $0x50] sm:$0xff]   ;;  %s340_s22 = scalar_lea.vmem [#allocation10], %s1297_s11  ;;  %s2209_s16 = scalar_lea.hbm %s2261_s7, %s1364_s21 }
  0x6a   : > { %1430 = vmatprep.subr.bf16.mxu0 %v1894_v0  ;;  %1450 = vmatprep.subr.bf16.mxu1 %v1894_v0  ;;  %v2119_v11 = vld [vmem:[%s2090_s29] sm:$0xff]   ;;  %v1663_v17 = vld [vmem:[#allocation5 + $0x48] sm:$0xff]   ;;  %vm2127_vm3 = vmand %vm358_vm2, %vm359_vm1  ;;  %s1181_s18 = sshll.u32 %s340_s22, 4  ;;  %s1168_s29 = scalar_lea.sflag [#allocation4], %s2086_s19  ;;  %s2211_s18 = int_to_ptr.vmem [resolvable:$true] %s1181_s18 }
  0x6b   : > { %v350_v13 = vshrl.u32 %v2119_v11, 16  ;;  %v1662_v14 = vld [vmem:[#allocation5 + $0x10] sm:$0xff]   ;;  %v353_v16 = vshll.u32 %v2119_v11, 16  ;;  %v1664_v18 = vld [vmem:[#allocation5 + $0x8] sm:$0xff]   ;;  %v1665_v21 = vld [vmem:[#allocation5 + $0x40] sm:$0xff]   ;;  %s1814_s30 = scalar_lea.vmem %s2211_s18, 256 }
  0x6c   : > { %v1666_v22 = vld [vmem:[#allocation5] sm:$0xff]   ;;  %v1668_v24 = vld [vmem:[#allocation5 + $0xb8] sm:$0xff]   ;;  %v1669_v26 = vld [vmem:[#allocation5 + $0xb0] sm:$0xff]   ;;  %p1815_p7 = scmp.ne.s32.totalorder %s2211_s18, %s1814_s30  ;;  %p2286_p1 = scmp.ne.s32.totalorder %s2274_s20, 0 }
  0x6d   : > { %1431 = vmatpush3.bf16.msra.mxu0 %v1653_v3  ;;  %1451 = vmatpush3.bf16.msra.mxu1 %v1654_v4  ;;  %v352_v15 = vrot.slane %v350_v13, 7  ;;  %v1676_v25 = vld [vmem:[#allocation8 + $0x38] sm:$0xff]   ;;  %v1677_v27 = vld [vmem:[#allocation8 + $0x30] sm:$0xff]   ;;  %v1670_v28 = vld [vmem:[#allocation5 + $0xa8] sm:$0xff]   ;;  %s1896_s28 = smov [#allocation10]  }
  0x6e   : > { %1432 = vmatprep.subr.bf16.mxu0 %v1894_v0  ;;  %1452 = vmatprep.subr.bf16.mxu1 %v1894_v0  ;;  %v1678_v29 = vld [vmem:[#allocation8 + $0x28] sm:$0xff]   ;;  %v1671_v30 = vld [vmem:[#allocation5 + $0xa0] sm:$0xff]   ;;  %v1672_v31 = vld [vmem:[#allocation5 + $0x98] sm:$0xff]   ;;  %p1816_p12 = pnand %p1815_p7, %p2286_p1  ;;  %s1818_s9 = sshll.u32 %s1896_s28, 4  ;;  %s1819_s9 = int_to_ptr.vmem [resolvable:$false] %s1818_s9 }
  0x6f   : > { %v355_v19 = vor.u32 %v353_v16, %v352_v15  ;;  %v1673_v32 = vld [vmem:[#allocation5 + $0x90] sm:$0xff]   ;;  %v1674_v33 = vld [vmem:[#allocation5 + $0x88] sm:$0xff]   ;;  %v362_v34 = vsel %vm2127_vm3, %v352_v15, 0  ;;  %v1675_v36 = vld [vmem:[#allocation5 + $0x80] sm:$0xff]   ;;  %s1820_s10 = scalar_lea.vmem %s1819_s9, 512  ;;  %p1821_p13 = scmp.lt.s32.totalorder %s2211_s18, %s1819_s9 }
  0x70   : > { %v596_v37 = vrot.slane %v362_v34, 1  ;;  %v1679_v39 = vld [vmem:[#allocation8 + $0x20] sm:$0xff]   ;;  %v1680_v40 = vld [vmem:[#allocation8 + $0x18] sm:$0xff]   ;;  %v1681_v41 = vld [vmem:[#allocation8 + $0x10] sm:$0xff]   ;;  %p1817_p9 = pneg %p1816_p12  ;;  %p1822_p0 = scmp.lt.s32.totalorder %s1820_s10, %s1814_s30 }
  0x71   : > { %1433 = vmatpush3.bf16.msra.mxu0 %v1655_v5  ;;  %1453 = vmatpush3.bf16.msra.mxu1 %v1656_v6  ;;  %v361_v23 = vsel %vm2127_vm3, 0, %v355_v19  ;;  %v1683_v42 = vld [vmem:[#allocation7 + $0x78] sm:$0xff]   ;;  %v1685_v43 = vld [vmem:[#allocation7 + $0x70] sm:$0xff]   ;;  %v1682_v44 = vld [vmem:[#allocation8 + $0x8] sm:$0xff]  }
  0x72   : > { %1434 = vmatprep.subr.bf16.mxu0 %v1894_v0  ;;  %1454 = vmatprep.subr.bf16.mxu1 %v1894_v0  ;;  %v595_v35 = vrot.slane %v361_v23, 1  ;;  %v1686_v45 = vld [vmem:[#allocation7 + $0x68] sm:$0xff]   ;;  %v1684_v46 = vld [vmem:[#allocation8] sm:$0xff]   ;;  %v1687_v48 = vld [vmem:[#allocation7 + $0x38] sm:$0xff]   ;;  %p1823_p2 = por %p1822_p0, %p1821_p13 }
  0x73   : > { %v1688_v47 = vld [vmem:[#allocation7 + $0x60] sm:$0xff]   ;;  %v1690_v49 = vld [vmem:[#allocation7 + $0x58] sm:$0xff]   ;;  %v1689_v50 = vld [vmem:[#allocation7 + $0x30] sm:$0xff]  }
  0x74   : > { %v597_v38 = vsel %vm594_vm4, %v595_v35, %v596_v37  ;;  %v1691_v51 = vld [vmem:[#allocation7 + $0x28] sm:$0xff]   ;;  %v1692_v52 = vld [vmem:[#allocation7 + $0x50] sm:$0xff]   ;;  %v1693_v53 = vld [vmem:[#allocation7 + $0x20] sm:$0xff]   ;;  %p1824_p10 = pnand %p1823_p2, %p1817_p9 }
  0x75   : > { %1435 = vmatpush3.bf16.msra.mxu0 %v1657_v7  ;;  %1455 = vmatpush3.bf16.msra.mxu1 %v1658_v8  ;;  %v1694_v54 = vld [vmem:[#allocation7 + $0x48] sm:$0xff]   ;;  %v1695_v55 = vld [vmem:[#allocation7 + $0x18] sm:$0xff]   ;;  %v1696_v56 = vld [vmem:[#allocation7 + $0x40] sm:$0xff]  }
  0x76   : > { %1436 = vmatprep.subr.bf16.mxu0 %v1894_v0  ;;  %1456 = vmatprep.subr.bf16.mxu1 %v1894_v0  ;;  %v1697_v57 = vld [vmem:[#allocation7 + $0x10] sm:$0xff]   ;;  %v1698_v58 = vld [vmem:[#allocation7 + $0x8] sm:$0xff]   ;;  %v1700_v59 = vld [vmem:[#allocation7] sm:$0xff]  }
  0x77   : > { %v1323_v8 = vld [vmem:[%s2256_s2] ss:$0 sm:$0xff] }
  0x79   : > { %1437 = vmatpush3.bf16.msra.mxu0 %v1659_v9  ;;  %1457 = vmatpush3.bf16.msra.mxu1 %v1660_v10 }
  0x7a   : > { %1438 = vmatprep.subr.bf16.mxu0 %v1894_v0  ;;  %1458 = vmatprep.subr.bf16.mxu1 %v1894_v0 }
  0x7d   : > { %1439 = vmatpush3.bf16.msra.mxu0 %v1661_v12  ;;  %1459 = vmatpush3.bf16.msra.mxu1 %v1662_v14 }
  0x7e   : > { %1440 = vmatprep.subr.bf16.mxu0 %v1894_v0  ;;  %1460 = vmatprep.subr.bf16.mxu1 %v1894_v0 }
  0x81   : > { %1441 = vmatpush3.bf16.msra.mxu0 %v1663_v17  ;;  %1461 = vmatpush3.bf16.msra.mxu1 %v1664_v18  ;;  %v1699_v18 = vld [vmem:[#allocation7 + $0xb8] sm:$0xff]  }
  0x82   : > { %1442 = vmatprep.subr.bf16.mxu0 %v1894_v0  ;;  %1462 = vmatprep.subr.bf16.mxu1 %v1894_v0 }
  0x85   : > { %1443 = vmatpush3.bf16.msra.mxu0 %v1665_v21  ;;  %1463 = vmatpush3.bf16.msra.mxu1 %v1666_v22  ;;  %v1701_v22 = vld [vmem:[#allocation7 + $0xb0] sm:$0xff]  }
  0x86   : > { %1468 = vmatprep.subr.bf16.mxu0 %v1894_v0  ;;  %1488 = vmatprep.subr.bf16.mxu1 %v1894_v0 }
  0x88   : > { %1445 = vmatmul.mubr.bf16.vlgmr.msra.gmra.mxu0 %v2119_v11  ;;  %1465 = vmatmul.mubr.bf16.vlgmr.msra.gmra.mxu1 %v361_v23 }
  0x89   : > { %1469 = vmatpush3.bf16.msra.mxu0 %v1668_v24  ;;  %1484 = vmatprep.mubr.msk.bf16.mxu0 %vm1895_vm0, %v1894_v0 }
  0x8a   : > { %1470 = vmatprep.subr.bf16.mxu0 %v1894_v0  ;;  %1489 = vmatpush3.bf16.msra.mxu1 %v1676_v25 }
  0x8b   : > { %1504 = vmatprep.mubr.msk.bf16.mxu1 %vm1895_vm0, %v1894_v0  ;;  %1490 = vmatprep.subr.bf16.mxu1 %v1894_v0 }
  0x8d   : > { %1471 = vmatpush3.bf16.msra.mxu0 %v1669_v26  ;;  %v1702_v26 = vld [vmem:[#allocation7 + $0xa8] sm:$0xff]  }
  0x8e   : > { %1472 = vmatprep.subr.bf16.mxu0 %v1894_v0  ;;  %1491 = vmatpush3.bf16.msra.mxu1 %v1677_v27 }
  0x8f   : > { %1492 = vmatprep.subr.bf16.mxu1 %v1894_v0 }
  0x91   : > { %1473 = vmatpush3.bf16.msra.mxu0 %v1670_v28  ;;  %v1703_v28 = vld [vmem:[#allocation7 + $0xa0] sm:$0xff]  }
  0x92   : > { %1474 = vmatprep.subr.bf16.mxu0 %v1894_v0  ;;  %1493 = vmatpush3.bf16.msra.mxu1 %v1678_v29  ;;  %v1704_v29 = vld [vmem:[#allocation7 + $0x98] sm:$0xff]  }
  0x93   : > { %1494 = vmatprep.subr.bf16.mxu1 %v1894_v0 }
  0x95   : > { %1475 = vmatpush3.bf16.msra.mxu0 %v1671_v30  ;;  %v1705_v30 = vld [vmem:[#allocation7 + $0x90] sm:$0xff]  }
  0x96   : > { %1476 = vmatprep.subr.bf16.mxu0 %v1894_v0  ;;  %1495 = vmatpush3.bf16.msra.mxu1 %v1679_v39 }
  0x97   : > { %1496 = vmatprep.subr.bf16.mxu1 %v1894_v0 }
  0x99   : > { %1477 = vmatpush3.bf16.msra.mxu0 %v1672_v31  ;;  %v1706_v31 = vld [vmem:[#allocation7 + $0x88] sm:$0xff]  }
  0x9a   : > { %1478 = vmatprep.subr.bf16.mxu0 %v1894_v0  ;;  %1497 = vmatpush3.bf16.msra.mxu1 %v1680_v40 }
  0x9b   : > { %1498 = vmatprep.subr.bf16.mxu1 %v1894_v0 }
  0x9d   : > { %1479 = vmatpush3.bf16.msra.mxu0 %v1673_v32  ;;  %v1707_v32 = vld [vmem:[#allocation7 + $0x80] sm:$0xff]  }
  0x9e   : > { %1480 = vmatprep.subr.bf16.mxu0 %v1894_v0  ;;  %1499 = vmatpush3.bf16.msra.mxu1 %v1681_v41 }
  0x9f   : > { %1500 = vmatprep.subr.bf16.mxu1 %v1894_v0 }
  0xa1   : > { %1481 = vmatpush3.bf16.msra.mxu0 %v1674_v33 }
  0xa2   : > { %1482 = vmatprep.subr.bf16.mxu0 %v1894_v0  ;;  %1501 = vmatpush3.bf16.msra.mxu1 %v1682_v44 }
  0xa3   : > { %1502 = vmatprep.subr.bf16.mxu1 %v1894_v0 }
  0xa5   : > { %1483 = vmatpush3.bf16.msra.mxu0 %v1675_v36 }
  0xa6   : > { %1508 = vmatprep.subr.bf16.mxu0 %v1894_v0  ;;  %1503 = vmatpush3.bf16.msra.mxu1 %v1684_v46 }
  0xa7   : > { %1528 = vmatprep.subr.bf16.mxu1 %v1894_v0 }
  0xa8   : > { %1485 = vmatmul.mubr.bf16.vlgmr.msra.gmra.mxu0 %v597_v38 }
  0xa9   : > { %1524 = vmatprep.mubr.msk.bf16.mxu0 %vm1895_vm0, %v1894_v0  ;;  %1509 = vmatpush3.bf16.msra.mxu0 %v1683_v42 }
  0xaa   : > { %1510 = vmatprep.subr.bf16.mxu0 %v1894_v0  ;;  %1505 = vmatmul.mubr.bf16.vlgmr.msra.gmra.mxu1 %v2119_v11 }
  0xab   : > { %1529 = vmatpush3.bf16.msra.mxu1 %v1687_v48  ;;  %1544 = vmatprep.mubr.msk.bf16.mxu1 %vm1895_vm0, %v1894_v0 }
  0xac   : > { %1530 = vmatprep.subr.bf16.mxu1 %v1894_v0 }
  0xad   : > { %1511 = vmatpush3.bf16.msra.mxu0 %v1685_v43 }
  0xae   : > { %1512 = vmatprep.subr.bf16.mxu0 %v1894_v0 }
  0xaf   : > { %1531 = vmatpush3.bf16.msra.mxu1 %v1689_v50 }
  0xb0   : > { %1532 = vmatprep.subr.bf16.mxu1 %v1894_v0 }
  0xb1   : > { %1513 = vmatpush3.bf16.msra.mxu0 %v1686_v45 }
  0xb2   : > { %1514 = vmatprep.subr.bf16.mxu0 %v1894_v0 }
  0xb3   : > { %1533 = vmatpush3.bf16.msra.mxu1 %v1691_v51 }
  0xb4   : > { %1534 = vmatprep.subr.bf16.mxu1 %v1894_v0 }
  0xb5   : > { %1515 = vmatpush3.bf16.msra.mxu0 %v1688_v47 }
  0xb6   : > { %1516 = vmatprep.subr.bf16.mxu0 %v1894_v0 }
  0xb7   : > { %1535 = vmatpush3.bf16.msra.mxu1 %v1693_v53 }
  0xb8   : > { %1536 = vmatprep.subr.bf16.mxu1 %v1894_v0 }
  0xb9   : > { %1517 = vmatpush3.bf16.msra.mxu0 %v1690_v49  ;;  %v1356_v49 = vld [vmem:[%s2258_s4] ss:$0 sm:$0xff] }
  0xba   : > { %1518 = vmatprep.subr.bf16.mxu0 %v1894_v0 }
  0xbb   : > { %1537 = vmatpush3.bf16.msra.mxu1 %v1695_v55 }
  0xbc   : > { %1538 = vmatprep.subr.bf16.mxu1 %v1894_v0 }
  0xbd   : > { %1519 = vmatpush3.bf16.msra.mxu0 %v1692_v52 }
  0xbe   : > { %1520 = vmatprep.subr.bf16.mxu0 %v1894_v0 }
  0xbf   : > { %1539 = vmatpush3.bf16.msra.mxu1 %v1697_v57 }
  0xc0   : > { %1540 = vmatprep.subr.bf16.mxu1 %v1894_v0 }
  0xc1   : > { %1521 = vmatpush3.bf16.msra.mxu0 %v1694_v54  ;;  %v1357_v54 = vld [vmem:[%s2260_s6] ss:$0 sm:$0xff] }
  0xc2   : > { %1522 = vmatprep.subr.bf16.mxu0 %v1894_v0 }
  0xc3   : > { %1541 = vmatpush3.bf16.msra.mxu1 %v1698_v58 }
  0xc4   : > { %1542 = vmatprep.subr.bf16.mxu1 %v1894_v0 }
  0xc5   : > { %1523 = vmatpush3.bf16.msra.mxu0 %v1696_v56 }
  0xc6   : > { %1548 = vmatprep.subr.bf16.mxu0 %v1894_v0 }
  0xc7   : > { %1543 = vmatpush3.bf16.msra.mxu1 %v1700_v59 }
 0x148   : > { %v479_v60 = vpop.f32.mrf.mxu0  ;;  %v568_v61 = vpop.f32.mrf.mxu1 }
 0x149   : > { %v569_v5 = vadd.f32 %v568_v61, %v479_v60 }
 0x14a   : > { %v1446_v62 = vpop.f32.mrf.mxu0  ;;  %v1466_v63 = vpop.f32.mrf.mxu1 }
 0x14c   : > { %v482_v1 = vpop.f32.mrf.mxu0  ;;  %v571_v2 = vpop.f32.mrf.mxu1 }
 0x14d   : > { %v572_v10 = vadd.f32 %v571_v2, %v482_v1 }
 0x14e   : > { %v1447_v3 = vpop.f32.mrf.mxu0  ;;  %v1467_v4 = vpop.f32.mrf.mxu1 }
 0x168   : > { %v681_v6 = vpop.f32.mrf.mxu0 }
 0x169   : > { %v688_v7 = vadd.f32 %v681_v6, %v569_v5 }
 0x16a   : > { %v1486_v9 = vpop.f32.mrf.mxu0  ;;  %v800_v37 = vpop.f32.mrf.mxu1 }
 0x16b   : > { %v697_v12 = vadd.f32 %v1323_v8, %v688_v7 }
 0x16c   : > { %v684_v11 = vpop.f32.mrf.mxu0  ;;  %v1506_v38 = vpop.f32.mrf.mxu1 }
 0x16d   : > { %v689_v13 = vadd.f32 %v684_v11, %v572_v10  ;;  %v699_v16 = vmax.f32 %v697_v12, 0.0 }
 0x16e   : > { %v1487_v14 = vpop.f32.mrf.mxu0  ;;  %v803_v39 = vpop.f32.mrf.mxu1 }
 0x16f   : > { %v698_v15 = vadd.f32 %v1323_v8, %v689_v13 }
 0x170   : > { %v1507_v40 = vpop.f32.mrf.mxu1 }
 0x171   : > { %v700_v17 = vmax.f32 %v698_v15, 0.0 }
 0x173   : > { %v701_v19 = vpack.c.bf16 %v700_v17, %v699_v16 }
 0x175   : > { %1525 = vmatmul.mubr.bf16.vlgmr.msra.gmra.mxu0 %v701_v19  ;;  %v808_v21 = vshrl.u32 %v701_v19, 16  ;;  %v811_v24 = vshll.u32 %v701_v19, 16 }
 0x176   : > { %1549 = vmatpush3.bf16.msra.mxu0 %v1699_v18  ;;  %1564 = vmatprep.mubr.msk.bf16.mxu0 %vm1895_vm0, %v1894_v0 }
 0x177   : > { %1550 = vmatprep.subr.bf16.mxu0 %v1894_v0  ;;  %v810_v23 = vrot.slane %v808_v21, 7 }
 0x179   : > { %v813_v25 = vor.u32 %v811_v24, %v810_v23  ;;  %v817_v33 = vsel %vm2127_vm3, %v810_v23, 0 }
 0x17a   : > { %1551 = vmatpush3.bf16.msra.mxu0 %v1701_v22  ;;  %v1049_v35 = vrot.slane %v817_v33, 1 }
 0x17b   : > { %v816_v27 = vsel %vm2127_vm3, 0, %v813_v25  ;;  %1552 = vmatprep.subr.bf16.mxu0 %v1894_v0 }
 0x17c   : > { %1545 = vmatmul.mubr.bf16.vlgmr.msra.gmra.mxu1 %v816_v27  ;;  %v1048_v34 = vrot.slane %v816_v27, 1 }
 0x17e   : > { %1553 = vmatpush3.bf16.msra.mxu0 %v1702_v26  ;;  %v1050_v36 = vsel %vm594_vm4, %v1048_v34, %v1049_v35 }
 0x17f   : > { %1554 = vmatprep.subr.bf16.mxu0 %v1894_v0 }
 0x182   : > { %1555 = vmatpush3.bf16.msra.mxu0 %v1703_v28 }
 0x183   : > { %1556 = vmatprep.subr.bf16.mxu0 %v1894_v0 }
 0x186   : > { %1557 = vmatpush3.bf16.msra.mxu0 %v1704_v29 }
 0x187   : > { %1558 = vmatprep.subr.bf16.mxu0 %v1894_v0 }
 0x18a   : > { %1559 = vmatpush3.bf16.msra.mxu0 %v1705_v30 }
 0x18b   : > { %1560 = vmatprep.subr.bf16.mxu0 %v1894_v0 }
 0x18e   : > { %1561 = vmatpush3.bf16.msra.mxu0 %v1706_v31 }
 0x18f   : > { %1562 = vmatprep.subr.bf16.mxu0 %v1894_v0 }
 0x192   : > { %1563 = vmatpush3.bf16.msra.mxu0 %v1707_v32 }
 0x195   : > { %1565 = vmatmul.mubr.bf16.vlgmr.msra.gmra.mxu0 %v1050_v36 }
 0x235   : > { %v933_v41 = vpop.f32.mrf.mxu0 }
 0x237   : > { %v1526_v42 = vpop.f32.mrf.mxu0 }
 0x239   : > { %v936_v43 = vpop.f32.mrf.mxu0 }
 0x23b   : > { %v1527_v44 = vpop.f32.mrf.mxu0 }
 0x23c   : > { %v1022_v45 = vpop.f32.mrf.mxu1 }
 0x23d   : > { %v1023_v47 = vadd.f32 %v1022_v45, %v933_v41 }
 0x23e   : > { %v1546_v0 = vpop.f32.mrf.mxu1 }
 0x240   : > { %v1025_v46 = vpop.f32.mrf.mxu1 }
 0x241   : > { %v1026_v52 = vadd.f32 %v1025_v46, %v936_v43 }
 0x242   : > { %v1547_v20 = vpop.f32.mrf.mxu1 }
 0x255   : > { %v1134_v48 = vpop.f32.mrf.mxu0 }
 0x256   : > { %v1141_v50 = vadd.f32 %v1134_v48, %v1023_v47 }
 0x257   : > { %v1566_v51 = vpop.f32.mrf.mxu0 }
 0x258   : > { %v1150_v53 = vadd.f32 %v1356_v49, %v1141_v50 }
 0x259   : > { %v1137_v55 = vpop.f32.mrf.mxu0 }
 0x25a   : > { %v1152_v56 = vadd.f32 %v1150_v53, %v800_v37  ;;  %v1142_v57 = vadd.f32 %v1137_v55, %v1026_v52 }
 0x25b   : > { %v1567_v58 = vpop.f32.mrf.mxu0 }
 0x25c   : > { %v1161_v59 = vadd.f32 %v1357_v54, %v1152_v56  ;;  %v1151_v60 = vadd.f32 %v1356_v49, %v1142_v57 }
 0x25e   : > { %v1163_v61 = vmax.f32 %v1161_v59, 0.0  ;;  %v1153_v62 = vadd.f32 %v1151_v60, %v803_v39 }
 0x260   : > { %1165 = vst [vmem:[%s340_s22] sm:$0xff] %v1163_v61  ;;  %v1162_v63 = vadd.f32 %v1357_v54, %v1153_v62 }
 0x262   : > { %v1164_v1 = vmax.f32 %v1162_v63, 0.0 }
 0x264   : > { %1166 = vst [vmem:[%s340_s22 + $0x8] sm:$0xff] %v1164_v1 }
 0x265   : > { %1827 = shalt.err (!%p1824_p10)
}
 0x266   : > { %s1828_s13 = scalar_lea.hbm %s2209_s16, 256  ;;  %s1832_s11 = scalar_lea.hbm %s2261_s7, 512 }
 0x267   : > { %p1829_p6 = scmp.ne.s32.totalorder %s2209_s16, %s1828_s13  ;;  %p1833_p3 = scmp.lt.s32.totalorder %s2209_s16, %s2261_s7 }
 0x268   : > { %p1834_p11 = scmp.lt.s32.totalorder %s1832_s11, %s1828_s13 }
 0x269   : > { %p1830_p4 = pnand %p1829_p6, %p2286_p1 }
 0x26a   : > { %p1835_p5 = por %p1834_p11, %p1833_p3 }
 0x26b   : > { %p1831_p8 = pneg %p1830_p4 }
 0x26d   : > { %p1836_p7 = pnand %p1835_p5, %p1831_p8 }
 0x26f   : > { %1839 = shalt.err (!%p1836_p7)
}
 0x270   : > { %s1897_s23 = smov 128   ;;  %s1898_s1 = smov 8  }
 0x271   : > { %1582 = dma.vmem_to_hbm [thread:$0]  (%p2286_p1), %s2211_s18, 256, %s2209_s16, %s1168_s29, %s1897_s23, %s1897_s23, %s1898_s1  }
 0x272 PF: > { %s1196_s30 = sand.u32 1, %s1874_s24   ;;  %p2287_p12 = scmp.ne.s32.totalorder %s2270_s8, 0 }
 0x273   : > { %p2288_p9 = scmp.ge.s32.totalorder %s1886_s27, 2  ;;  %s1197_s28 = scalar_lea.sflag [#allocation4], %s1196_s30 }
 0x275   : > { %p1599_p13 = pnand %p2288_p9, %p2287_p12 }
 0x277   : > { %p1600_p0 = pneg %p1599_p13 }
 0x279   : > { %1869 = dma.done.wait (%p1600_p0), %s1197_s28, 256  }
 0x27a   : > { %1871 = vsyncadd (%p1600_p0), %s1197_s28, 4294967040  ;;  %p22_p2 = scmp.ge.s32.totalorder %s2028_s14, 4   ;;  %s2289_s24 = smov %s1878_s25 }
 0x27b   : > { %s2290_s25 = smov %s1882_s26  ;;  %s2291_s26 = smov %s2038_s17 }
 0x27c   : > { %s2292_s27 = smov %s2028_s14  ;;  %24 = sbr.rel (!%p22_p2) target bundleno = 9 (0x9), region = 109 }
 0x281   :  { %1202 = vsyncpa [#allocation3], 1 }
 0x282   :  { %1204 = vsyncpa [#allocation3 + $0x1], 1 }
 0x283   :  { %1205 = vsyncpa [#allocation6], 1 }
 0x284   :  { %1206 = vsyncpa [#allocation9], 1 }
 0x285   :  { %1207 = vsyncpa [#allocation4], 1 }
 0x286   :  { %1209 = vsyncpa [#allocation4 + $0x1], 1 }

</bundles_post_ra>
